<compile_context>
chip_gen: v7x
topology: tpu7x:2x2x1
jax: 0.10.0
libtpu: 0.0.40
codegen_flags: <defaults>
</compile_context>

<pallas_src>
import functools

import jax
import jax.numpy as jnp
from jax.experimental import pallas as pl
from jax.experimental.pallas import tpu as pltpu


def _gate_kernel(a_ref, b_ref, c_ref, wg_ref, bg_ref, wo_ref, bo_ref, out_ref, *,
                 method):
    A = a_ref[...]            # (TILE_B, D)
    B = b_ref[...]
    C = c_ref[...]

    # Gate logits: row-wise dot with each stream's weight vector + scalar bias.
    # (VPU multiply + XLU keepdims-reduce; MXU stays free for the projection.)
    a_logit = jnp.sum(A * wg_ref[0:1, :], axis=1, keepdims=True) + bg_ref[0]
    b_logit = jnp.sum(B * wg_ref[1:2, :], axis=1, keepdims=True) + bg_ref[1]
    c_logit = jnp.sum(C * wg_ref[2:3, :], axis=1, keepdims=True) + bg_ref[2]

    a_w = jax.nn.sigmoid(a_logit)      # (TILE_B, 1) — EUP transcendental
    b_w = jax.nn.sigmoid(b_logit)
    c_w = jax.nn.sigmoid(c_logit)

    # Sigmoid outputs are in (0,1), so total > 0: safe to invert (exact division
    # to match the torch.div reference bit-for-bit within f32 rounding).
    inv_total = pl.reciprocal(a_w + b_w + c_w, approx=False)

    if method == "addition":
        # (a/T)*A + (b/T)*B + (c/T)*C == (a*A + b*B + c*C) * (1/T)
        combined = (a_w * A + b_w * B + c_w * C) * inv_total        # (TILE_B, D)
        out = jnp.dot(combined, wo_ref[...],
                      preferred_element_type=jnp.float32)           # (TILE_B, Cls)
    else:  # 'concat' — decompose W_out into three (D, Cls) blocks, never concat.
        d = A.shape[1]
        wo = wo_ref[...]
        out = jnp.dot((a_w * inv_total) * A, wo[0:d, :],
                      preferred_element_type=jnp.float32)
        out = out + jnp.dot((b_w * inv_total) * B, wo[d:2 * d, :],
                            preferred_element_type=jnp.float32)
        out = out + jnp.dot((c_w * inv_total) * C, wo[2 * d:3 * d, :],
                            preferred_element_type=jnp.float32)

    # Single lane-dense store of the whole output tile (bias broadcast (1, Cls)).
    out_ref[...] = (out + bo_ref[...]).astype(out_ref.dtype)


def gate_forward(A, B, C, params, *, method="addition", tile_b=None):
    """Pallas equivalent of Gate.forward(A, B, C). Returns (batch, num_classes) f32."""
    n, d = A.shape
    num_classes = params["wo"].shape[1]
    if tile_b is None:
        tile_b = n if n <= 512 else 512          # biggest tile that comfortably fits VMEM
    grid = (pl.cdiv(n, tile_b),)

    kernel = functools.partial(_gate_kernel, method=method)
    return pl.pallas_call(
        kernel,
        out_shape=jax.ShapeDtypeStruct((n, num_classes), jnp.float32),
        grid=grid,
        in_specs=[
            pl.BlockSpec((tile_b, d), lambda i: (i, 0)),                  # A tile
            pl.BlockSpec((tile_b, d), lambda i: (i, 0)),                  # B tile
            pl.BlockSpec((tile_b, d), lambda i: (i, 0)),                  # C tile
            pl.BlockSpec(params["wg"].shape, lambda i: (0, 0)),           # (3, D) gate weights
            pl.BlockSpec(memory_space=pltpu.MemorySpace.SMEM),            # (3,) gate biases
            pl.BlockSpec(params["wo"].shape, lambda i: (0, 0)),           # (D or 3D, Cls)
            pl.BlockSpec(params["bo"].shape, lambda i: (0, 0)),           # (1, Cls)
        ],
        out_specs=pl.BlockSpec((tile_b, num_classes), lambda i: (i, 0)),
        compiler_params=pltpu.CompilerParams(
            dimension_semantics=("parallel",)),   # batch tiles are independent
    )(A, B, C, params["wg"], params["bg"], params["wo"], params["bo"])


# ----------------------------- pure-JAX reference ----------------------------
def _gate_ref(A, B, C, params, method="addition"):
    wg, bg, wo, bo = params["wg"], params["bg"], params["wo"], params["bo"]
    a_w = jax.nn.sigmoid(A @ wg[0][:, None] + bg[0])
    b_w = jax.nn.sigmoid(B @ wg[1][:, None] + bg[1])
    c_w = jax.nn.sigmoid(C @ wg[2][:, None] + bg[2])
    total = a_w + b_w + c_w
    an, bn, cn = a_w / total, b_w / total, c_w / total
    if method == "addition":
        combined = an * A + bn * B + cn * C
    else:
        combined = jnp.concatenate([an * A, bn * B, cn * C], axis=1)
    return combined @ wo + bo[0]


# ---------------------------------- driver -----------------------------------
if __name__ == "__main__":
    batch, input_dim, num_classes = 16, 32, 2
    tile_b = 8  # exercise a multi-step (pipelined) grid even at toy size

    key = jax.random.PRNGKey(0)
    k = jax.random.split(key, 8)
    A = jax.random.normal(k[0], (batch, input_dim), jnp.float32)
    B = jax.random.normal(k[1], (batch, input_dim), jnp.float32)
    C = jax.random.normal(k[2], (batch, input_dim), jnp.float32)

    # xavier_normal-ish init for the (1, input_dim) gate weights, stacked to (3, D)
    gate_std = (2.0 / (input_dim + 1)) ** 0.5
    params_add = {
        "wg": jax.random.normal(k[3], (3, input_dim), jnp.float32) * gate_std,
        "bg": jax.random.normal(k[4], (3,), jnp.float32) * 0.1,
        "wo": jax.random.normal(k[5], (input_dim, num_classes), jnp.float32) * 0.2,
        "bo": jax.random.normal(k[6], (1, num_classes), jnp.float32) * 0.1,
    }
    params_cat = dict(params_add)
    params_cat["wo"] = jax.random.normal(
        k[7], (3 * input_dim, num_classes), jnp.float32) * 0.2

    # method='addition' (module default)
    out_add = jax.block_until_ready(
        gate_forward(A, B, C, params_add, method="addition", tile_b=tile_b))
    ref_add = _gate_ref(A, B, C, params_add, method="addition")
    assert out_add.shape == (batch, num_classes), out_add.shape
    assert jnp.allclose(out_add, ref_add, atol=1e-4, rtol=1e-4), "addition mismatch"

    # method='concat'
    out_cat = jax.block_until_ready(
        gate_forward(A, B, C, params_cat, method="concat", tile_b=tile_b))
    ref_cat = _gate_ref(A, B, C, params_cat, method="concat")
    assert out_cat.shape == (batch, num_classes), out_cat.shape
    assert jnp.allclose(out_cat, ref_cat, atol=1e-4, rtol=1e-4), "concat mismatch"

    print("KERNEL_OK")
</pallas_src>

<mosaic_0001>
module attributes {stable_mosaic.version = 11 : i64} {
  func.func @_gate_kernel(%arg0: i32, %arg1: memref<8x32xf32, #tpu.memory_space<vmem>>, %arg2: memref<8x32xf32, #tpu.memory_space<vmem>>, %arg3: memref<8x32xf32, #tpu.memory_space<vmem>>, %arg4: memref<3x32xf32, #tpu.memory_space<vmem>>, %arg5: memref<3xf32, #tpu.memory_space<smem>>, %arg6: memref<32x2xf32, #tpu.memory_space<vmem>>, %arg7: memref<1x2xf32, #tpu.memory_space<vmem>>, %arg8: memref<8x2xf32, #tpu.memory_space<vmem>>) attributes {dimension_semantics = [#tpu.dimension_semantics<parallel>], iteration_bounds = array<i64: 2>, scalar_prefetch = 0 : i64, scratch_operands = 0 : i64, tpu.core_type = #tpu.core_type<tc>, window_params = [{transform_indices = @transform_0, window_bounds = array<i64: 8, 32>}, {transform_indices = @transform_1, window_bounds = array<i64: 8, 32>}, {transform_indices = @transform_2, window_bounds = array<i64: 8, 32>}, {pipeline_mode = #tpu.pipeline_mode<synchronous>, transform_indices = @transform_3, window_bounds = array<i64: 3, 32>}, {transform_indices = @transform_4, window_bounds = array<i64: 3>}, {pipeline_mode = #tpu.pipeline_mode<synchronous>, transform_indices = @transform_5, window_bounds = array<i64: 32, 2>}, {pipeline_mode = #tpu.pipeline_mode<synchronous>, transform_indices = @transform_6, window_bounds = array<i64: 1, 2>}, {transform_indices = @transform_7, window_bounds = array<i64: 8, 2>}]} {
    %c0 = arith.constant 0 : index
    %c0_0 = arith.constant 0 : index
    %0 = vector.load %arg1[%c0, %c0_0] : memref<8x32xf32, #tpu.memory_space<vmem>>, vector<8x32xf32>
    %c0_1 = arith.constant 0 : index
    %c0_2 = arith.constant 0 : index
    %1 = vector.load %arg2[%c0_1, %c0_2] : memref<8x32xf32, #tpu.memory_space<vmem>>, vector<8x32xf32>
    %c0_3 = arith.constant 0 : index
    %c0_4 = arith.constant 0 : index
    %2 = vector.load %arg3[%c0_3, %c0_4] : memref<8x32xf32, #tpu.memory_space<vmem>>, vector<8x32xf32>
    %c0_5 = arith.constant 0 : index
    %c0_6 = arith.constant 0 : index
    %3 = vector.load %arg4[%c0_5, %c0_6] : memref<3x32xf32, #tpu.memory_space<vmem>>, vector<1x32xf32>
    %4 = vector.broadcast %3 : vector<1x32xf32> to vector<8x32xf32>
    %5 = arith.mulf %0, %4 : vector<8x32xf32>
    %cst = arith.constant dense<0.000000e+00> : vector<8xf32>
    %6 = vector.multi_reduction <add>, %5, %cst [1] : vector<8x32xf32> to vector<8xf32>
    %7 = vector.shape_cast %6 : vector<8xf32> to vector<8x1xf32>
    %c0_7 = arith.constant 0 : index
    %8 = memref.load %arg5[%c0_7] : memref<3xf32, #tpu.memory_space<smem>>
    %9 = vector.broadcast %8 : f32 to vector<8x1xf32>
    %10 = arith.addf %7, %9 : vector<8x1xf32>
    %c1 = arith.constant 1 : index
    %c0_8 = arith.constant 0 : index
    %11 = vector.load %arg4[%c1, %c0_8] : memref<3x32xf32, #tpu.memory_space<vmem>>, vector<1x32xf32>
    %12 = vector.broadcast %11 : vector<1x32xf32> to vector<8x32xf32>
    %13 = arith.mulf %1, %12 : vector<8x32xf32>
    %cst_9 = arith.constant dense<0.000000e+00> : vector<8xf32>
    %14 = vector.multi_reduction <add>, %13, %cst_9 [1] : vector<8x32xf32> to vector<8xf32>
    %15 = vector.shape_cast %14 : vector<8xf32> to vector<8x1xf32>
    %c1_10 = arith.constant 1 : index
    %16 = memref.load %arg5[%c1_10] : memref<3xf32, #tpu.memory_space<smem>>
    %17 = vector.broadcast %16 : f32 to vector<8x1xf32>
    %18 = arith.addf %15, %17 : vector<8x1xf32>
    %c2 = arith.constant 2 : index
    %c0_11 = arith.constant 0 : index
    %19 = vector.load %arg4[%c2, %c0_11] : memref<3x32xf32, #tpu.memory_space<vmem>>, vector<1x32xf32>
    %20 = vector.broadcast %19 : vector<1x32xf32> to vector<8x32xf32>
    %21 = arith.mulf %2, %20 : vector<8x32xf32>
    %cst_12 = arith.constant dense<0.000000e+00> : vector<8xf32>
    %22 = vector.multi_reduction <add>, %21, %cst_12 [1] : vector<8x32xf32> to vector<8xf32>
    %23 = vector.shape_cast %22 : vector<8xf32> to vector<8x1xf32>
    %c2_13 = arith.constant 2 : index
    %24 = memref.load %arg5[%c2_13] : memref<3xf32, #tpu.memory_space<smem>>
    %25 = vector.broadcast %24 : f32 to vector<8x1xf32>
    %26 = arith.addf %23, %25 : vector<8x1xf32>
    %27 = arith.negf %10 : vector<8x1xf32>
    %28 = math.exp %27 : vector<8x1xf32>
    %cst_14 = arith.constant 1.000000e+00 : f32
    %29 = vector.broadcast %cst_14 : f32 to vector<8x1xf32>
    %30 = arith.addf %29, %28 : vector<8x1xf32>
    %31 = arith.divf %29, %30 : vector<8x1xf32>
    %32 = arith.negf %18 : vector<8x1xf32>
    %33 = math.exp %32 : vector<8x1xf32>
    %cst_15 = arith.constant 1.000000e+00 : f32
    %34 = vector.broadcast %cst_15 : f32 to vector<8x1xf32>
    %35 = arith.addf %34, %33 : vector<8x1xf32>
    %36 = arith.divf %34, %35 : vector<8x1xf32>
    %37 = arith.negf %26 : vector<8x1xf32>
    %38 = math.exp %37 : vector<8x1xf32>
    %cst_16 = arith.constant 1.000000e+00 : f32
    %39 = vector.broadcast %cst_16 : f32 to vector<8x1xf32>
    %40 = arith.addf %39, %38 : vector<8x1xf32>
    %41 = arith.divf %39, %40 : vector<8x1xf32>
    %42 = arith.addf %31, %36 : vector<8x1xf32>
    %43 = arith.addf %42, %41 : vector<8x1xf32>
    %44 = tpu.reciprocal %43 : vector<8x1xf32> -> vector<8x1xf32>
    %45 = vector.broadcast %31 : vector<8x1xf32> to vector<8x32xf32>
    %46 = arith.mulf %45, %0 : vector<8x32xf32>
    %47 = vector.broadcast %36 : vector<8x1xf32> to vector<8x32xf32>
    %48 = arith.mulf %47, %1 : vector<8x32xf32>
    %49 = arith.addf %46, %48 : vector<8x32xf32>
    %50 = vector.broadcast %41 : vector<8x1xf32> to vector<8x32xf32>
    %51 = arith.mulf %50, %2 : vector<8x32xf32>
    %52 = arith.addf %49, %51 : vector<8x32xf32>
    %53 = vector.broadcast %44 : vector<8x1xf32> to vector<8x32xf32>
    %54 = arith.mulf %52, %53 : vector<8x32xf32>
    %c0_17 = arith.constant 0 : index
    %c0_18 = arith.constant 0 : index
    %55 = vector.load %arg6[%c0_17, %c0_18] : memref<32x2xf32, #tpu.memory_space<vmem>>, vector<32x2xf32>
    %cst_19 = arith.constant dense<0.000000e+00> : vector<8x2xf32>
    %56 = tpu.matmul %54, %55, %cst_19 {dimension_numbers = #tpu.dot_dimension_numbers<[1], [0], [0], [1], [0, 0, 1, 1], [], []>} : vector<8x32xf32>, vector<32x2xf32>, vector<8x2xf32> -> vector<8x2xf32>
    %c0_20 = arith.constant 0 : index
    %c0_21 = arith.constant 0 : index
    %57 = vector.load %arg7[%c0_20, %c0_21] : memref<1x2xf32, #tpu.memory_space<vmem>>, vector<1x2xf32>
    %58 = vector.broadcast %57 : vector<1x2xf32> to vector<8x2xf32>
    %59 = arith.addf %56, %58 : vector<8x2xf32>
    %c0_22 = arith.constant 0 : index
    %c0_23 = arith.constant 0 : index
    %60 = vector.load %arg8[%c0_22, %c0_23] : memref<8x2xf32, #tpu.memory_space<vmem>>, vector<8x2xf32>
    tpu.vector_store %arg8[%c0_22, %c0_23], %59 {strides = array<i32>} : memref<8x2xf32, #tpu.memory_space<vmem>>, vector<8x2xf32>,
    return
  }
  func.func @transform_0(%arg0: i32) -> (i32, i32) {
    %c0_i32 = arith.constant 0 : i32
    %c0_i32_0 = arith.constant 0 : i32
    return %arg0, %c0_i32 : i32, i32
  }
  func.func @transform_1(%arg0: i32) -> (i32, i32) {
    %c0_i32 = arith.constant 0 : i32
    %c0_i32_0 = arith.constant 0 : i32
    return %arg0, %c0_i32 : i32, i32
  }
  func.func @transform_2(%arg0: i32) -> (i32, i32) {
    %c0_i32 = arith.constant 0 : i32
    %c0_i32_0 = arith.constant 0 : i32
    return %arg0, %c0_i32 : i32, i32
  }
  func.func @transform_3(%arg0: i32) -> (i32, i32) {
    %c0_i32 = arith.constant 0 : i32
    %c0_i32_0 = arith.constant 0 : i32
    %c0_i32_1 = arith.constant 0 : i32
    return %c0_i32, %c0_i32_0 : i32, i32
  }
  func.func @transform_4(%arg0: i32) -> i32 {
    %c0_i32 = arith.constant 0 : i32
    %c0_i32_0 = arith.constant 0 : i32
    return %c0_i32 : i32
  }
  func.func @transform_5(%arg0: i32) -> (i32, i32) {
    %c0_i32 = arith.constant 0 : i32
    %c0_i32_0 = arith.constant 0 : i32
    %c0_i32_1 = arith.constant 0 : i32
    return %c0_i32, %c0_i32_0 : i32, i32
  }
  func.func @transform_6(%arg0: i32) -> (i32, i32) {
    %c0_i32 = arith.constant 0 : i32
    %c0_i32_0 = arith.constant 0 : i32
    %c0_i32_1 = arith.constant 0 : i32
    return %c0_i32, %c0_i32_0 : i32, i32
  }
  func.func @transform_7(%arg0: i32) -> (i32, i32) {
    %c0_i32 = arith.constant 0 : i32
    %c0_i32_0 = arith.constant 0 : i32
    return %arg0, %c0_i32 : i32, i32
  }
}

</mosaic_0001>

<bundles_post_ra>
// kernel: tpu_custom_call.1
= control target key start
LH: loop header
LB: loop body
LE: loop exit
PB: predicated region body
PF: predicated region fallthrough
CT: control target
= control target key end

     0   :  { %12 = vsyncpa [#allocation3], 0  ;;  %s1021_s0 = inlined_call_operand.vmem [shape: f32[16,32], index: 0, kind: input, shape index: {}]   ;;  %s1022_s1 = inlined_call_operand.vmem [shape: f32[16,32], index: 1, kind: input, shape index: {}]   ;;  %s1023_s2 = inlined_call_operand.hbm [shape: f32[16,32], index: 2, kind: input, shape index: {}]   ;;  %s1024_s3 = inlined_call_operand.vmem [shape: f32[3,32], index: 3, kind: input, shape index: {}]   ;;  %s1025_s4 = inlined_call_operand.vmem [shape: f32[3], index: 4, kind: input, shape index: {}]   ;;  %s1026_s5 = inlined_call_operand.vmem [shape: f32[32,2], index: 5, kind: input, shape index: {}]   ;;  %s1027_s6 = inlined_call_operand.vmem [shape: f32[1,2], index: 6, kind: input, shape index: {}]   ;;  %s1028_s7 = inlined_call_operand.vmem [shape: f32[16,2], index: 7, kind: output, shape index: {}]  }
   0x1   :  { %14 = vsyncpa [#allocation3 + $0x1], 0 }
   0x2   :  { %15 = vsyncpa [#allocation4], 0  ;;  %s839_s24 = smov 0   ;;  %s841_s25 = smov 0  }
   0x3   :  { %s843_s26 = smov 0   ;;  %s845_s27 = smov 0  }
   0x4 LB: > { %s858_s28 = sadd.s32 4294967295, %s792_s27   ;;  %p93_p0 = scmp.ne.s32.totalorder %s784_s25, %s780_s24  ;;  %s792_s27 = sphi %s845_s27, %s1042_s27   ;;  %s788_s26 = sphi %s843_s26, %s1041_s26   ;;  %s784_s25 = sphi %s841_s25, %s1040_s25   ;;  %s780_s24 = sphi %s839_s24, %s1039_s24  }
   0x5   : > { %p1029_p1 = scmp.eq.s32.totalorder %s858_s28, 0  ;;  %p597_p2 = scmp.ge.s32.totalorder %s792_s27, 1 }
   0x6   : > { %p214_p3 = scmp.lt.s32.totalorder %s792_s27, 3  ;;  %s230_s9 = sshll.u32 %s1025_s4, 4  ;;  %s231_s9 = int_to_ptr.vmem [resolvable:$true] %s230_s9 }
   0x7   : > { %p866_p4 = por %p1029_p1, %p93_p0  ;;  %s880_s11 = sadd.s32 1, %s792_s27  }
   0x8   : > { %p873_p5 = pnand %p597_p2, %p214_p3  ;;  %s77_s13 = ssub.s32 %s792_s27, %s880_s11 }
   0x9   : > { %s1031_s29 = scalar_select %p866_p4, 1, 0 }
   0xa   : > { %p648_p6 = pneg %p873_p5  ;;  %p890_p8 = scmp.eq.s32.totalorder %s77_s13, 0 }
   0xb   : > { %s80_s15 = sadd.s32 1, %s788_s26  ;;  %p87_p9 = scmp.ne.s32.totalorder %s788_s26, %s784_s25 }
   0xc   : > { %p884_p7 = pnand %p648_p6, %p1029_p1  ;;  %s709_s16 = scalar_lea.vmem %s231_s9, 16 }
   0xd   : > { %p710_p10 = scmp.ne.s32.totalorder %s231_s9, %s709_s16  ;;  %p717_p0 = scmp.lt.s32.totalorder %s231_s9, %s231_s9 }
   0xe   : > { %p711_p11 = pneg %p884_p7  ;;  %p718_p2 = scmp.lt.s32.totalorder %s709_s16, %s709_s16 }
  0x10   : > { %p712_p12 = pnand %p711_p11, %p710_p10  ;;  %p719_p3 = por %p718_p2, %p717_p0 }
  0x12   : > { %p713_p13 = pneg %p712_p12 }
  0x14   : > { %p720_p6 = pnand %p719_p3, %p713_p13 }
  0x16   : > { %723 = shalt.err (!%p720_p6)
}
  0x17   : > { %s794_s17 = smov [#allocation5]   ;;  %p88_p10 = scmp.eq.s32.totalorder %s792_s27, 0 }
  0x18   : > { %651 = dma.vmem_to_smem (!%p884_p7), %s231_s9, 16, %s794_s17, [#allocation4]  }
  0x19   : > { %s904_s18 = scalar_select %p890_p8, %s788_s26, %s80_s15  }
  0x1a   : > { %p657_p11 = scmp.lt.s32.totalorder %s792_s27, 2  ;;  %s261_s19 = sand.u32 1, %s788_s26  }
  0x1b   : > { %s601_s20 = sshll.u32 %s792_s27, 7  ;;  %p89_p12 = por %p88_p10, %p87_p9 }
  0x1c   : > { %s600_s21 = sshll.u32 %s261_s19, 3  ;;  %s916_s24 = scalar_lea.hbm %s1023_s2, %s601_s20 }
  0x1d   : > { %p918_p7 = pnand %p657_p11, %p89_p12  ;;  %s265_s8 = scalar_lea.vmem [#allocation2], %s600_s21 }
  0x1e   : > { %s272_s27 = sshll.u32 %s265_s8, 4  ;;  %s262_s9 = scalar_lea.sflag [#allocation3], %s261_s19  ;;  %s922_s27 = int_to_ptr.vmem [resolvable:$true] %s272_s27 }
  0x1f   : > { %s724_s12 = scalar_lea.hbm %s916_s24, 128  ;;  %p726_p9 = pneg %p918_p7 }
  0x20   : > { %p725_p8 = scmp.ne.s32.totalorder %s916_s24, %s724_s12  ;;  %s729_s15 = scalar_lea.hbm %s1023_s2, 256 }
  0x21   : > { %p730_p2 = scmp.lt.u32.totalorder %s916_s24, %s1023_s2  ;;  %p731_p3 = scmp.lt.u32.totalorder %s729_s15, %s724_s12 }
  0x22   : > { %p727_p13 = pnand %p726_p9, %p725_p8  ;;  %p733_p10 = scmp.lt.u32.totalorder %s724_s12, %s916_s24 }
  0x23   : > { %p732_p6 = por %p731_p3, %p730_p2 }
  0x24   : > { %p728_p0 = pneg %p727_p13 }
  0x25   : > { %p734_p11 = por %p733_p10, %p732_p6 }
  0x27   : > { %p735_p12 = pnand %p734_p11, %p728_p0 }
  0x29   : > { %738 = shalt.err (!%p735_p12)
}
  0x2a   : > { %s739_s19 = scalar_lea.vmem %s922_s27, 128  ;;  %s795_s20 = smov [#allocation2]  }
  0x2b   : > { %p740_p8 = scmp.ne.s32.totalorder %s922_s27, %s739_s19  ;;  %s744_s21 = sshll.u32 %s795_s20, 4  ;;  %s745_s21 = int_to_ptr.vmem [resolvable:$false] %s744_s21 }
  0x2c   : > { %s746_s22 = scalar_lea.vmem %s745_s21, 256  ;;  %p747_p4 = scmp.lt.s32.totalorder %s922_s27, %s745_s21 }
  0x2d   : > { %p742_p13 = pnand %p740_p8, %p726_p9  ;;  %p748_p2 = scmp.lt.s32.totalorder %s746_s22, %s739_s19 }
  0x2f   : > { %p743_p1 = pneg %p742_p13  ;;  %p749_p3 = por %p748_p2, %p747_p4 }
  0x31   : > { %p750_p6 = pnand %p749_p3, %p743_p1 }
  0x33   : > { %753 = shalt.err (!%p750_p6)
}
  0x34   : > { %655 = dma.hbm_to_vmem [thread:$0]  (!%p918_p7), %s916_s24, 128, %s922_s27, %s262_s9  }
  0x35   : > { %281 = sbr.rel (%p873_p5) target bundleno = 482 (0x1e2), region = 48  ;;  %s283_s23 = sand.u32 (!%p873_p5), 1, %s784_s25  }
  0x36   : > { %s603_s8 = sshll.u32 (!%p873_p5), %s283_s23, 3  ;;  %s284_s12 = scalar_lea.sflag (!%p873_p5), [#allocation3], %s283_s23 }
  0x37   : > { %s287_s13 = scalar_lea.vmem (!%p873_p5), [#allocation2], %s603_s8  ;;  %p1036_p9 = scmp.ne.s32.totalorder (!%p873_p5), %s1031_s29, 0 }
  0x3c   : > { %771 = dma.done.wait (%p1036_p9), %s284_s12, 128  }
  0x3d   : > { %773 = vsyncadd (%p1036_p9), %s284_s12, 4294967168  ;;  %p1037_p1 = scmp.eq.s32.totalorder %s858_s28, 0 }
  0x3f   : > { %775 = dma.done.wait (%p1037_p1), [#allocation4], 16   ;;  %p1038_p4 = pmov %p1037_p1 }
  0x41   : > { %777 = vsyncadd (%p1038_p4), [#allocation4], 4294967280 }
  0x42   : > { %296 = sfence }
  0x43   : > { %p330_p5 = scmp.lt.s32.totalorder %s858_s28, 1  ;;  %v961_v0 = vld [vmem:[%s287_s13] sm:$0xff]  ;;  %vm351_vm0 = vcmask 261120   ;;  %v411_v14 = vld [vmem:[%s1026_s5 + $0x10] sm:$0xff]  ;;  %v796_v15 = vmov 0.0|0.0   ;;  %v412_v17 = vld [vmem:[%s1026_s5 + $0x18] sm:$0xff] }
  0x44   : > { %v611_v1 = vld [vmem:[%s1024_s3 + $0x2] ss:$0 sm:$0xff]  ;;  %v608_v3 = vld [vmem:[%s1024_s3] ss:$0 sm:$0xff]  ;;  %v609_v4 = vld [vmem:[%s1024_s3 + $0x1] ss:$0 sm:$0xff]  ;;  %636 = vmatprep.subr.bf16.mxu0 %v796_v15  ;;  %v640_v19 = vpack.c.bf16 %v412_v17, %v411_v14 }
  0x45   : > { %s1044_s28 = smov (!%p330_p5, %s858_s28), 1  ;;  %v375_v2 = vmul.f32 %v611_v1, %v961_v0  ;;  %v409_v12 = vld [vmem:[%s1026_s5] sm:$0xff]  ;;  %v410_v13 = vld [vmem:[%s1026_s5 + $0x8] sm:$0xff]  ;;  %vm797_vm1 = vmmov 0   ;;  %v798_v18 = vmov 0.0   ;;  %s612_s30 = sld [smem:[#allocation5 + $0x2]] }
  0x46   : > { %s968_s29 = sshll.u32 %s1044_s28, 3  ;;  %v637_v16 = vpack.c.bf16 %v410_v13, %v409_v12  ;;  %633 = vmatprep.mubr.msk.f32.mxu0 %vm797_vm1, %v798_v18  ;;  %s355_s27 = sld [smem:[#allocation5]]  ;;  %v616_v50 = vld [vmem:[%s1027_s6] ss:$0 sm:$0xff]  ;;  %vm493_vm2 = vcmask 15360  }
  0x47   : > { %v376_v5 = vsel %vm351_vm0, %v375_v2, 0.0  ;;  %s333_s17 = scalar_lea.vmem %s1021_s0, %s968_s29  ;;  %s337_s28 = scalar_lea.vmem %s1022_s1, %s968_s29 }
  0x48   : > { %377 = vadd.xlane.f32.xlu1 %v376_v5  ;;  %v342_v6 = vld [vmem:[%s333_s17] sm:$0xff]  ;;  %638 = vmatpush3.bf16.msra.mxu0 %v637_v16  ;;  %s610_s9 = sld [smem:[#allocation5 + $0x1]]  ;;  %s341_s19 = scalar_lea.vmem %s1028_s7, %s968_s29 }
  0x49   : > { %v343_v7 = vld [vmem:[%s337_s28] sm:$0xff]  ;;  %v350_v8 = vmul.f32 %v608_v3, %v342_v6  ;;  %639 = vmatprep.subr.bf16.mxu0 %v796_v15 }
  0x4a   : > { %v363_v9 = vmul.f32 %v609_v4, %v343_v7 }
  0x4b   : > { %v352_v10 = vsel %vm351_vm0, %v350_v8, 0.0  ;;  %v380_v20 = vstv %s612_s30 }
  0x4c   : > { %353 = vadd.xlane.f32.xlu0 %v352_v10  ;;  %v364_v11 = vsel %vm351_vm0, %v363_v9, 0.0  ;;  %641 = vmatpush3.bf16.msra.mxu0 %v640_v19  ;;  %v356_v23 = vstv %s355_s27 }
  0x4e   : > { %v368_v27 = vstv %s610_s9 }
  0x50   : > { %365 = vadd.xlane.f32.xlu0 %v364_v11 }
  0xd5   : > { %v378_v21 = vpop.xlane.xlu1 %377 }
  0xd6   : > { %v381_v22 = vadd.f32 %v380_v20, %v378_v21 }
  0xd8   : > { %v615_v24 = vmul.f32 -1.442695, %v381_v22 }
  0xd9   : > { %v354_v25 = vpop.xlane.xlu0 %353 }
  0xda   : > { %v357_v26 = vadd.f32 %v356_v23, %v354_v25  ;;  %695 = vpow2.f32 %v615_v24 }
  0xdc   : > { %v613_v28 = vmul.f32 -1.442695, %v357_v26 }
  0xdd   : > { %v366_v29 = vpop.xlane.xlu0 %365 }
  0xde   : > { %697 = vpow2.f32 %v613_v28  ;;  %v369_v30 = vadd.f32 %v368_v27, %v366_v29 }
  0xe0   : > { %v614_v31 = vmul.f32 -1.442695, %v369_v30 }
  0xe2   : > { %699 = vpow2.f32 %v614_v31 }
  0xe4   : > { %v696_v32 = vpop.eup %695 }
  0xe5   : > { %v397_v34 = vadd.f32 1.0, %v696_v32 }
  0xe7   : > { %701 = vrcp.f32 %v397_v34 }
  0xe8   : > { %v698_v33 = vpop.eup %697 }
  0xe9   : > { %v385_v35 = vadd.f32 1.0, %v698_v33 }
  0xeb   : > { %703 = vrcp.f32 %v385_v35 }
  0xec   : > { %v700_v36 = vpop.eup %699 }
  0xed   : > { %v391_v37 = vadd.f32 1.0, %v700_v36 }
  0xef   : > { %705 = vrcp.f32 %v391_v37 }
  0xf1   : > { %v702_v38 = vpop.eup %701 }
  0xf2   : > { %v406_v46 = vmul.f32 %v702_v38, %v961_v0 }
  0xf5   : > { %v704_v39 = vpop.eup %703 }
  0xf6   : > { %v403_v44 = vmul.f32 %v704_v39, %v342_v6 }
  0xf9   : > { %v706_v40 = vpop.eup %705 }
  0xfa   : > { %v400_v41 = vadd.f32 %v706_v40, %v704_v39  ;;  %v404_v43 = vmul.f32 %v706_v40, %v343_v7 }
  0xfc   : > { %v401_v42 = vadd.f32 %v702_v38, %v400_v41  ;;  %v405_v45 = vadd.f32 %v404_v43, %v403_v44 }
  0xfe   : > { %707 = vrcp.f32 %v401_v42  ;;  %v407_v47 = vadd.f32 %v406_v46, %v405_v45 }
 0x108   : > { %v708_v48 = vpop.eup %707 }
 0x109   : > { %v408_v49 = vmul.f32 %v708_v48, %v407_v47 }
 0x10b   : > { %634 = vmatmul.mubr.msk.f32.vlgmr.msra.gmra.mrb[0].mxu0 %vm351_vm0, %v408_v49 }
 0x1de   : > { %v489_v51 = vpop.f32.mrb[0].mxu0 }
 0x1df   : > { %v490_v52 = vadd.f32 %v616_v50, %v489_v51  ;;  %v635_v53 = vpop.f32.mrb[1].mxu0 }
 0x1e1   : > { %494 = vst.msk [vmem:[%s341_s19] sm:$0xff] %vm493_vm2, %v490_v52 }
 0x1e2 PF: > { %p18_p7 = scmp.ge.s32.totalorder %s880_s11, 4   ;;  %s1039_s24 = smov %s784_s25 }
 0x1e3   : > { %s1040_s25 = smov %s788_s26  ;;  %s1041_s26 = smov %s904_s18 }
 0x1e4   : > { %s1042_s27 = smov %s880_s11  ;;  %20 = sbr.rel (!%p18_p7) target bundleno = 4 (0x4), region = 99 }
 0x1eb   :  { %514 = vsyncpa [#allocation3], 1 }
 0x1ec   :  { %516 = vsyncpa [#allocation3 + $0x1], 1 }
 0x1ed   :  { %517 = vsyncpa [#allocation4], 1 }
 0x1ee   :  { %519 = vsyncpa [#allocation4 + $0x1], 1 }

</bundles_post_ra>
